<compile_context>
chip_gen: v6e
topology: v6e:2x2x1
jax: 0.10.0
libtpu: 0.0.40
codegen_flags: <defaults>
</compile_context>

<pallas_src>
import functools

import jax
import jax.numpy as jnp
from jax.experimental import pallas as pl
from jax.experimental.pallas import tpu as pltpu

_LANE = 128                                # lane (last-dim) tiling unit
_FUSED_VMEM_BUDGET = 24 * 1024 * 1024      # conservative: fits v7x 64MiB / default scoped limits


def _round_up(n, m):
    return ((n + m - 1) // m) * m


def _pick_batch_tile(m):
    # Pick the batch tile (multiple of 128, <=512) that minimizes padded rows;
    # ties go to the larger tile (fewer grid steps / better pipelining).
    cands = (512, 384, 256, 128)
    mp, neg_t = min((_round_up(m, t), -t) for t in cands)
    return -neg_t


def _pick_tile(dim_p, cap=512):
    for t in (cap, 384, 256, 128):
        if dim_p % t == 0:
            return t
    return dim_p


# ---------------------------------------------------------------------------
# Fused MLP kernel: one (TM, D0) batch tile flows through every layer in VMEM.
# refs = (x_ref, w0, b0, w1, b1, ..., w_{L-1}, b_{L-1}, o_ref)
# ---------------------------------------------------------------------------
def _fused_mlp_kernel(*refs, num_layers):
    x_ref = refs[0]
    o_ref = refs[1 + 2 * num_layers]
    h = x_ref[...]                                   # bf16 (TM, D0)
    for l in range(num_layers):
        w = refs[1 + 2 * l][...]                     # bf16 (D_in, D_out)
        b = refs[2 + 2 * l][...]                     # f32  (1, D_out)
        y = jnp.dot(h, w, preferred_element_type=jnp.float32) + b
        if l + 1 < num_layers:
            h = jnp.maximum(y, 0.0).astype(jnp.bfloat16)   # ReLU, back to bf16 for MXU
        else:
            o_ref[...] = y.astype(o_ref.dtype)             # final Linear: no ReLU


def fused_mlp_pallas(x, w_pads, b_pads, out_size):
    """y = final_linear(relu(... relu(x @ W0 + b0) ...)) in a single kernel."""
    M, K = x.shape
    L = len(w_pads)
    D = [w.shape[0] for w in w_pads] + [w_pads[-1].shape[1]]   # padded layer dims
    assert K <= D[0]

    TM = _pick_batch_tile(M)
    Mp = _round_up(M, TM)

    # Pad batch/feature dims with zeros (safe: padded feature columns stay zero through
    # the stack because the padded weight/bias columns are zero; padded batch rows never
    # mix with real rows and are sliced off at the end) and cast once to bf16.
    if Mp == M and K == D[0]:
        xp = x.astype(jnp.bfloat16)
    else:
        xp = jnp.zeros((Mp, D[0]), jnp.float32).at[:M, :K].set(x).astype(jnp.bfloat16)

    in_specs = [pl.BlockSpec((TM, D[0]), lambda i: (i, 0))]
    inputs = [xp]
    for l in range(L):
        d_in, d_out = D[l], D[l + 1]
        in_specs.append(pl.BlockSpec((d_in, d_out), lambda i: (0, 0)))   # weight: VMEM-resident
        in_specs.append(pl.BlockSpec((1, d_out), lambda i: (0, 0)))      # bias:   VMEM-resident
        inputs.extend([w_pads[l], b_pads[l]])

    flops = 2 * Mp * sum(D[l] * D[l + 1] for l in range(L))
    bytes_accessed = (int(xp.size) * 2
                      + sum(int(w.size) * 2 for w in w_pads)
                      + sum(int(b.size) * 4 for b in b_pads)
                      + Mp * D[-1] * 4)

    out = pl.pallas_call(
        functools.partial(_fused_mlp_kernel, num_layers=L),
        out_shape=jax.ShapeDtypeStruct((Mp, D[-1]), jnp.float32),
        grid=(Mp // TM,),
        in_specs=in_specs,
        out_specs=pl.BlockSpec((TM, D[-1]), lambda i: (i, 0)),
        compiler_params=pltpu.CompilerParams(
            dimension_semantics=("parallel",),
            vmem_limit_bytes=48 * 1024 * 1024),
        cost_estimate=pl.CostEstimate(flops=flops, transcendentals=0,
                                      bytes_accessed=bytes_accessed),
    )(*inputs)
    return out[:M, :out_size]


# ---------------------------------------------------------------------------
# Per-layer fallback: large-tile matmul with K-reduction grid axis. Used only
# when the fused weights would not fit comfortably in VMEM. Operates entirely
# on padded bf16 activations (final layer emits f32).
# ---------------------------------------------------------------------------
def _linear_kernel(x_ref, w_ref, b_ref, o_ref, acc_ref, *, apply_relu):
    k = pl.program_id(2)

    @pl.when(k == 0)
    def _():
        acc_ref[...] = jnp.zeros_like(acc_ref)

    acc_ref[...] += jnp.dot(x_ref[...], w_ref[...],
                            preferred_element_type=jnp.float32)

    @pl.when(k == pl.num_programs(2) - 1)
    def _():
        y = acc_ref[...] + b_ref[...]
        if apply_relu:
            y = jnp.maximum(y, 0.0)
        o_ref[...] = y.astype(o_ref.dtype)


def linear_pallas_padded(xp, w_pad, b_pad, *, apply_relu, out_dtype, tm):
    """y = (relu?)(xp @ W + b) on pre-padded bf16 activations / weights."""
    Mp, Kp = xp.shape
    Kw, Np = w_pad.shape
    assert Kp == Kw and Mp % tm == 0

    TM = tm
    TN = _pick_tile(Np)
    TK = _pick_tile(Kp)
    grid = (Mp // TM, Np // TN, Kp // TK)

    flops = 2 * Mp * Np * Kp
    bytes_accessed = (int(xp.size) * 2 + int(w_pad.size) * 2
                      + int(b_pad.size) * 4
                      + Mp * Np * jnp.dtype(out_dtype).itemsize)

    return pl.pallas_call(
        functools.partial(_linear_kernel, apply_relu=apply_relu),
        out_shape=jax.ShapeDtypeStruct((Mp, Np), out_dtype),
        grid_spec=pltpu.PrefetchScalarGridSpec(
            num_scalar_prefetch=0,
            grid=grid,
            in_specs=[
                pl.BlockSpec((TM, TK), lambda i, j, k: (i, k)),
                pl.BlockSpec((TK, TN), lambda i, j, k: (k, j)),
                pl.BlockSpec((1, TN), lambda i, j, k: (0, j)),
            ],
            out_specs=pl.BlockSpec((TM, TN), lambda i, j, k: (i, j)),
            scratch_shapes=[pltpu.VMEM((TM, TN), jnp.float32)],
        ),
        compiler_params=pltpu.CompilerParams(
            dimension_semantics=("parallel", "parallel", "arbitrary"),
            vmem_limit_bytes=48 * 1024 * 1024),
        cost_estimate=pl.CostEstimate(flops=flops, transcendentals=0,
                                      bytes_accessed=bytes_accessed),
    )(xp, w_pad, b_pad)


# ---------------------------------------------------------------------------
# Module
# ---------------------------------------------------------------------------
class DNNPallas:
    """Pallas port of the PyTorch DNN module (Linear+ReLU+Dropout stack, final Linear)."""

    def __init__(self, input_size, output_size, hidden_units,
                 dropout_rate=0.5, use_bn=False, key=None):
        if not isinstance(hidden_units, (int, list)):
            raise ValueError('hidden_units must be a list of int or int')
        if isinstance(hidden_units, int):
            hidden_units = [hidden_units]
        if use_bn:
            # TODO(synk): BatchNorm1d path (use_bn=True) not implemented; default module path is use_bn=False.
            raise NotImplementedError("use_bn=True not supported in this Pallas port")
        if key is None:
            key = jax.random.PRNGKey(0)

        dims = [input_size] + list(hidden_units) + [output_size]
        self.dims = dims
        self.params = []        # unpadded f32 params (used by the plain-JAX reference)
        self.w_pad = []         # lane-padded bf16 weights [Din_p, Dout_p], padded once at init
        self.b_pad = []         # lane-padded f32 biases [1, Dout_p]
        for i in range(len(dims) - 1):
            fan_in, fan_out = dims[i], dims[i + 1]
            key, kw, kb = jax.random.split(key, 3)
            # Matches nn.Linear default init: U(-1/sqrt(fan_in), 1/sqrt(fan_in)).
            bound = 1.0 / (fan_in ** 0.5)
            w = jax.random.uniform(kw, (fan_in, fan_out), jnp.float32, -bound, bound)
            b = jax.random.uniform(kb, (fan_out,), jnp.float32, -bound, bound)
            self.params.append((w, b))

            din_p = _round_up(fan_in, _LANE)
            dout_p = _round_up(fan_out, _LANE)
            wp = jnp.zeros((din_p, dout_p), jnp.float32).at[:fan_in, :fan_out].set(w)
            bp = jnp.zeros((1, dout_p), jnp.float32).at[0, :fan_out].set(b)
            self.w_pad.append(wp.astype(jnp.bfloat16))
            self.b_pad.append(bp)

        # Decide whether the fully-fused single-kernel path fits in VMEM.
        d_pad = [w.shape[0] for w in self.w_pad] + [self.w_pad[-1].shape[1]]
        weight_bytes = sum(int(w.size) * 2 + int(b.size) * 4
                           for w, b in zip(self.w_pad, self.b_pad))
        tm_max = 512
        act_bytes = (2 * tm_max * d_pad[0] * 2      # x block (bf16, double-buffered)
                     + 2 * tm_max * d_pad[-1] * 4   # out block (f32, double-buffered)
                     + 4 * tm_max * max(d_pad) * 4) # in-kernel activation temporaries
        self._fused_ok = (2 * weight_bytes + act_bytes) <= _FUSED_VMEM_BUDGET
        self._use_fused = self._fused_ok

        # TODO(synk): Dropout is stochastic; implemented as identity (PyTorch eval() semantics).
        self.dropout_rate = dropout_rate

    def _forward_layered(self, x):
        # Fallback path: weights too big to keep resident -> per-layer kernels.
        # Activations stay padded bf16 across layers; slice only at the very end.
        M, K = x.shape
        TM = _pick_batch_tile(M)
        Mp = _round_up(M, TM)
        K0 = self.w_pad[0].shape[0]
        if Mp == M and K == K0:
            h = x.astype(jnp.bfloat16)
        else:
            h = jnp.zeros((Mp, K0), jnp.float32).at[:M, :K].set(x).astype(jnp.bfloat16)
        L = len(self.w_pad)
        for l in range(L):
            last = (l == L - 1)
            h = linear_pallas_padded(
                h, self.w_pad[l], self.b_pad[l],
                apply_relu=not last,
                out_dtype=jnp.float32 if last else jnp.bfloat16,
                tm=TM)
        return h[:M, :self.dims[-1]]

    def __call__(self, x):
        if self._use_fused:
            return fused_mlp_pallas(x, self.w_pad, self.b_pad, self.dims[-1])
        return self._forward_layered(x)

    def reference(self, x):
        """Plain-JAX f32 reference for correctness checking."""
        h = x
        for (w, b) in self.params[:-1]:
            h = jnp.maximum(h @ w + b, 0.0)
        w, b = self.params[-1]
        return h @ w + b


if __name__ == "__main__":
    batch, input_size, hidden_units, output_size = 4, 16, [32, 64], 8

    key = jax.random.PRNGKey(0)
    key_x, key_p = jax.random.split(key)
    x = jax.random.normal(key_x, (batch, input_size), jnp.float32)

    model = DNNPallas(input_size, output_size, hidden_units,
                      dropout_rate=0.5, use_bn=False, key=key_p)

    # Fused single-kernel path (default for this model size).
    y_fused = jax.block_until_ready(model(x))

    # Also exercise the per-layer fallback path to keep it verified.
    model._use_fused = False
    y_layered = jax.block_until_ready(model(x))
    model._use_fused = model._fused_ok

    y_ref = model.reference(x)

    assert y_fused.shape == (batch, output_size)
    assert y_layered.shape == (batch, output_size)
    # bf16 matmul inputs with f32 accumulation -> loose tolerance vs f32 reference.
    assert jnp.allclose(y_fused, y_ref, atol=5e-2, rtol=5e-2), "fused path mismatch vs reference"
    assert jnp.allclose(y_layered, y_ref, atol=5e-2, rtol=5e-2), "layered path mismatch vs reference"
    assert jnp.allclose(y_fused, y_layered, atol=2e-2, rtol=2e-2), "fused vs layered mismatch"

    print("KERNEL_OK")
</pallas_src>

<mosaic_0001>
module attributes {stable_mosaic.version = 11 : i64} {
  func.func @_fused_mlp_kernel(%arg0: i32, %arg1: memref<128x128xbf16, #tpu.memory_space<vmem>>, %arg2: memref<128x128xbf16, #tpu.memory_space<vmem>>, %arg3: memref<1x128xf32, #tpu.memory_space<vmem>>, %arg4: memref<128x128xbf16, #tpu.memory_space<vmem>>, %arg5: memref<1x128xf32, #tpu.memory_space<vmem>>, %arg6: memref<128x128xbf16, #tpu.memory_space<vmem>>, %arg7: memref<1x128xf32, #tpu.memory_space<vmem>>, %arg8: memref<128x128xf32, #tpu.memory_space<vmem>>) attributes {dimension_semantics = [#tpu.dimension_semantics<parallel>], iteration_bounds = array<i64: 1>, scalar_prefetch = 0 : i64, scratch_operands = 0 : i64, tpu.core_type = #tpu.core_type<tc>, window_params = [{transform_indices = @transform_0, window_bounds = array<i64: 128, 128>}, {pipeline_mode = #tpu.pipeline_mode<synchronous>, transform_indices = @transform_1, window_bounds = array<i64: 128, 128>}, {pipeline_mode = #tpu.pipeline_mode<synchronous>, transform_indices = @transform_2, window_bounds = array<i64: 1, 128>}, {pipeline_mode = #tpu.pipeline_mode<synchronous>, transform_indices = @transform_3, window_bounds = array<i64: 128, 128>}, {pipeline_mode = #tpu.pipeline_mode<synchronous>, transform_indices = @transform_4, window_bounds = array<i64: 1, 128>}, {pipeline_mode = #tpu.pipeline_mode<synchronous>, transform_indices = @transform_5, window_bounds = array<i64: 128, 128>}, {pipeline_mode = #tpu.pipeline_mode<synchronous>, transform_indices = @transform_6, window_bounds = array<i64: 1, 128>}, {transform_indices = @transform_7, window_bounds = array<i64: 128, 128>}]} {
    %c0 = arith.constant 0 : index
    %c0_0 = arith.constant 0 : index
    %0 = vector.load %arg1[%c0, %c0_0] : memref<128x128xbf16, #tpu.memory_space<vmem>>, vector<128x128xbf16>
    %c0_1 = arith.constant 0 : index
    %c0_2 = arith.constant 0 : index
    %1 = vector.load %arg2[%c0_1, %c0_2] : memref<128x128xbf16, #tpu.memory_space<vmem>>, vector<128x128xbf16>
    %c0_3 = arith.constant 0 : index
    %c0_4 = arith.constant 0 : index
    %2 = vector.load %arg3[%c0_3, %c0_4] : memref<1x128xf32, #tpu.memory_space<vmem>>, vector<1x128xf32>
    %cst = arith.constant dense<0.000000e+00> : vector<128x128xf32>
    %3 = tpu.matmul %0, %1, %cst {dimension_numbers = #tpu.dot_dimension_numbers<[1], [0], [0], [1], [0, 0, 1, 1], [], []>} : vector<128x128xbf16>, vector<128x128xbf16>, vector<128x128xf32> -> vector<128x128xf32>
    %4 = vector.broadcast %2 : vector<1x128xf32> to vector<128x128xf32>
    %5 = arith.addf %3, %4 : vector<128x128xf32>
    %cst_5 = arith.constant 0.000000e+00 : f32
    %6 = vector.broadcast %cst_5 : f32 to vector<128x128xf32>
    %7 = arith.maximumf %5, %6 : vector<128x128xf32>
    %8 = arith.truncf %7 : vector<128x128xf32> to vector<128x128xbf16>
    %c0_6 = arith.constant 0 : index
    %c0_7 = arith.constant 0 : index
    %9 = vector.load %arg4[%c0_6, %c0_7] : memref<128x128xbf16, #tpu.memory_space<vmem>>, vector<128x128xbf16>
    %c0_8 = arith.constant 0 : index
    %c0_9 = arith.constant 0 : index
    %10 = vector.load %arg5[%c0_8, %c0_9] : memref<1x128xf32, #tpu.memory_space<vmem>>, vector<1x128xf32>
    %cst_10 = arith.constant dense<0.000000e+00> : vector<128x128xf32>
    %11 = tpu.matmul %8, %9, %cst_10 {dimension_numbers = #tpu.dot_dimension_numbers<[1], [0], [0], [1], [0, 0, 1, 1], [], []>} : vector<128x128xbf16>, vector<128x128xbf16>, vector<128x128xf32> -> vector<128x128xf32>
    %12 = vector.broadcast %10 : vector<1x128xf32> to vector<128x128xf32>
    %13 = arith.addf %11, %12 : vector<128x128xf32>
    %cst_11 = arith.constant 0.000000e+00 : f32
    %14 = vector.broadcast %cst_11 : f32 to vector<128x128xf32>
    %15 = arith.maximumf %13, %14 : vector<128x128xf32>
    %16 = arith.truncf %15 : vector<128x128xf32> to vector<128x128xbf16>
    %c0_12 = arith.constant 0 : index
    %c0_13 = arith.constant 0 : index
    %17 = vector.load %arg6[%c0_12, %c0_13] : memref<128x128xbf16, #tpu.memory_space<vmem>>, vector<128x128xbf16>
    %c0_14 = arith.constant 0 : index
    %c0_15 = arith.constant 0 : index
    %18 = vector.load %arg7[%c0_14, %c0_15] : memref<1x128xf32, #tpu.memory_space<vmem>>, vector<1x128xf32>
    %cst_16 = arith.constant dense<0.000000e+00> : vector<128x128xf32>
    %19 = tpu.matmul %16, %17, %cst_16 {dimension_numbers = #tpu.dot_dimension_numbers<[1], [0], [0], [1], [0, 0, 1, 1], [], []>} : vector<128x128xbf16>, vector<128x128xbf16>, vector<128x128xf32> -> vector<128x128xf32>
    %20 = vector.broadcast %18 : vector<1x128xf32> to vector<128x128xf32>
    %21 = arith.addf %19, %20 : vector<128x128xf32>
    %c0_17 = arith.constant 0 : index
    %c0_18 = arith.constant 0 : index
    %22 = vector.load %arg8[%c0_17, %c0_18] : memref<128x128xf32, #tpu.memory_space<vmem>>, vector<128x128xf32>
    tpu.vector_store %arg8[%c0_17, %c0_18], %21 {strides = array<i32>} : memref<128x128xf32, #tpu.memory_space<vmem>>, vector<128x128xf32>,
    return
  }
  func.func @transform_0(%arg0: i32) -> (i32, i32) {
    %c0_i32 = arith.constant 0 : i32
    %c0_i32_0 = arith.constant 0 : i32
    return %arg0, %c0_i32 : i32, i32
  }
  func.func @transform_1(%arg0: i32) -> (i32, i32) {
    %c0_i32 = arith.constant 0 : i32
    %c0_i32_0 = arith.constant 0 : i32
    %c0_i32_1 = arith.constant 0 : i32
    return %c0_i32, %c0_i32_0 : i32, i32
  }
  func.func @transform_2(%arg0: i32) -> (i32, i32) {
    %c0_i32 = arith.constant 0 : i32
    %c0_i32_0 = arith.constant 0 : i32
    %c0_i32_1 = arith.constant 0 : i32
    return %c0_i32, %c0_i32_0 : i32, i32
  }
  func.func @transform_3(%arg0: i32) -> (i32, i32) {
    %c0_i32 = arith.constant 0 : i32
    %c0_i32_0 = arith.constant 0 : i32
    %c0_i32_1 = arith.constant 0 : i32
    return %c0_i32, %c0_i32_0 : i32, i32
  }
  func.func @transform_4(%arg0: i32) -> (i32, i32) {
    %c0_i32 = arith.constant 0 : i32
    %c0_i32_0 = arith.constant 0 : i32
    %c0_i32_1 = arith.constant 0 : i32
    return %c0_i32, %c0_i32_0 : i32, i32
  }
  func.func @transform_5(%arg0: i32) -> (i32, i32) {
    %c0_i32 = arith.constant 0 : i32
    %c0_i32_0 = arith.constant 0 : i32
    %c0_i32_1 = arith.constant 0 : i32
    return %c0_i32, %c0_i32_0 : i32, i32
  }
  func.func @transform_6(%arg0: i32) -> (i32, i32) {
    %c0_i32 = arith.constant 0 : i32
    %c0_i32_0 = arith.constant 0 : i32
    %c0_i32_1 = arith.constant 0 : i32
    return %c0_i32, %c0_i32_0 : i32, i32
  }
  func.func @transform_7(%arg0: i32) -> (i32, i32) {
    %c0_i32 = arith.constant 0 : i32
    %c0_i32_0 = arith.constant 0 : i32
    return %arg0, %c0_i32 : i32, i32
  }
}

</mosaic_0001>

<bundles_post_ra>
// kernel: tpu_custom_call.1
= control target key start
LH: loop header
LB: loop body
LE: loop exit
PB: predicated region body
PF: predicated region fallthrough
CT: control target
= control target key end

     0   :  { %12 = vsyncpa [#allocation3], 0  ;;  %s1169_s0 = inlined_call_operand.hbm [shape: bf16[128,128], index: 0, kind: input, shape index: {}]   ;;  %s1170_s1 = inlined_call_operand.hbm [shape: bf16[128,128], index: 1, kind: input, shape index: {}]   ;;  %s1171_s2 = inlined_call_operand.vmem [shape: f32[1,128], index: 2, kind: input, shape index: {}]   ;;  %s1172_s3 = inlined_call_operand.hbm [shape: bf16[128,128], index: 3, kind: input, shape index: {}]   ;;  %s1173_s4 = inlined_call_operand.vmem [shape: f32[1,128], index: 4, kind: input, shape index: {}]   ;;  %s1174_s5 = inlined_call_operand.hbm [shape: bf16[128,128], index: 5, kind: input, shape index: {}]   ;;  %s1175_s6 = inlined_call_operand.vmem [shape: f32[1,128], index: 6, kind: input, shape index: {}]   ;;  %s1176_s7 = inlined_call_operand.hbm [shape: f32[128,128], index: 7, kind: output, shape index: {}]  }
   0x1   :  { %13 = vsyncpa [#allocation6], 0 }
   0x2   :  { %14 = vsyncpa [#allocation9], 0 }
   0x3   :  { %15 = vsyncpa [#allocation4], 0  ;;  %s1078_s24 = smov [#allocation5]   ;;  %s1079_s26 = smov [#allocation2]  }
   0x4   :  { %s33_s25 = sshll.u32 %s1078_s24, 4  ;;  %s21_s27 = sshll.u32 %s1079_s26, 4  ;;  %s34_s25 = int_to_ptr.vmem [resolvable:$true] %s33_s25  ;;  %s22_s27 = int_to_ptr.vmem [resolvable:$true] %s21_s27 }
   0x5   :  { %s978_s28 = scalar_lea.vmem %s34_s25, 1024  ;;  %p983_p1 = scmp.lt.s32.totalorder %s34_s25, %s34_s25 }
   0x6   :  { %p979_p0 = scmp.ne.s32.totalorder %s34_s25, %s978_s28  ;;  %p984_p2 = scmp.lt.s32.totalorder %s978_s28, %s978_s28 }
   0x8   :  { %p985_p3 = por %p984_p2, %p983_p1 }
   0xa   :  { %p986_p4 = pnand %p985_p3, %p979_p0 }
   0xc   :  { %989 = shalt.err (!%p986_p4)
}
   0xd   :  { %s1080_s29 = smov 64   ;;  %s1081_s30 = smov 4  }
   0xe   :  { %39 = dma.hbm_to_vmem [thread:$0]  %s1170_s1, 1024, %s34_s25, [#allocation6], %s1080_s29, %s1080_s29, %s1081_s30  }
   0xf   :  { %s998_s10 = scalar_lea.vmem %s22_s27, 1024  ;;  %p1003_p6 = scmp.lt.s32.totalorder %s22_s27, %s22_s27 }
  0x10   :  { %p999_p5 = scmp.ne.s32.totalorder %s22_s27, %s998_s10  ;;  %p1004_p7 = scmp.lt.s32.totalorder %s998_s10, %s998_s10 }
  0x12   :  { %p1005_p8 = por %p1004_p7, %p1003_p6 }
  0x14   :  { %p1006_p9 = pnand %p1005_p8, %p999_p5 }
  0x16   :  { %1009 = shalt.err (!%p1006_p9)
}
  0x17   :  { %27 = dma.hbm_to_vmem [thread:$0]  %s1169_s0, 1024, %s22_s27, [#allocation3], %s1080_s29, %s1080_s29, %s1081_s30  }
  0x18   :  { %s1082_s13 = smov [#allocation7]   ;;  %s1083_s15 = smov [#allocation8]  }
  0x19   :  { %s47_s14 = sshll.u32 %s1082_s13, 4  ;;  %s61_s16 = sshll.u32 %s1083_s15, 4  ;;  %s48_s14 = int_to_ptr.vmem [resolvable:$true] %s47_s14  ;;  %s62_s16 = int_to_ptr.vmem [resolvable:$true] %s61_s16 }
  0x1a   :  { %s1018_s1 = scalar_lea.vmem %s48_s14, 1024  ;;  %p1023_p11 = scmp.lt.s32.totalorder %s48_s14, %s48_s14 }
  0x1b   :  { %p1019_p10 = scmp.ne.s32.totalorder %s48_s14, %s1018_s1  ;;  %p1024_p12 = scmp.lt.s32.totalorder %s1018_s1, %s1018_s1 }
  0x1d   :  { %p1025_p13 = por %p1024_p12, %p1023_p11 }
  0x1f   :  { %p1026_p0 = pnand %p1025_p13, %p1019_p10 }
  0x21   :  { %1029 = shalt.err (!%p1026_p0)
}
  0x22   :  { %53 = dma.hbm_to_vmem [thread:$0]  %s1172_s3, 1024, %s48_s14, [#allocation6], %s1080_s29, %s1080_s29, %s1081_s30  }
  0x23   :  { %s1038_s0 = scalar_lea.vmem %s62_s16, 1024  ;;  %p1043_p2 = scmp.lt.s32.totalorder %s62_s16, %s62_s16 }
  0x24   :  { %p1039_p1 = scmp.ne.s32.totalorder %s62_s16, %s1038_s0  ;;  %p1044_p3 = scmp.lt.s32.totalorder %s1038_s0, %s1038_s0 }
  0x26   :  { %p1045_p4 = por %p1044_p3, %p1043_p2 }
  0x28   :  { %p1046_p5 = pnand %p1045_p4, %p1039_p1 }
  0x2a   :  { %1049 = shalt.err (!%p1046_p5)
}
  0x2b   :  { %67 = dma.hbm_to_vmem [thread:$0]  %s1174_s5, 1024, %s62_s16, [#allocation9], %s1080_s29, %s1080_s29, %s1081_s30  }
  0x2c   :  { %1070 = dma.done.wait [#allocation3], 1024  }
  0x2d   :  { %1071 = vsyncadd [#allocation3], 4294966272 }
  0x2e   :  { %1072 = dma.done.wait [#allocation6], 2048  }
  0x2f   :  { %1073 = vsyncadd [#allocation6], 4294965248 }
  0x30   :  { %1074 = dma.done.wait [#allocation9], 1024  }
  0x31   :  { %1075 = vsyncadd [#allocation9], 4294966272  ;;  %v938_v0 = vld [vmem:[#allocation5 + $0x38] sm:$0xff]   ;;  %v939_v1 = vld [vmem:[#allocation5 + $0x30] sm:$0xff]  }
  0x32   :  { %817 = vmatprep.subr.bf16.mxu0 %v938_v0  ;;  %v940_v2 = vld [vmem:[#allocation5 + $0x28] sm:$0xff]   ;;  %v941_v3 = vld [vmem:[#allocation5 + $0x20] sm:$0xff]   ;;  %v942_v5 = vld [vmem:[#allocation5 + $0x18] sm:$0xff]  }
  0x33   :  { %818 = vmatpush3.bf16.msra.mxu0 %v938_v0  ;;  %v946_v4 = vld [vmem:[#allocation2] sm:$0xff]   ;;  %v943_v6 = vld [vmem:[#allocation5 + $0x10] sm:$0xff]   ;;  %v954_v7 = vld [vmem:[#allocation7 + $0x38] sm:$0xff]  }
  0x34   :  { %819 = vmatprep.subr.bf16.mxu0 %v939_v1  ;;  %833 = vmatprep.mubr.bf16.mxu0 %v946_v4  ;;  %v955_v8 = vld [vmem:[#allocation7 + $0x30] sm:$0xff]   ;;  %v944_v9 = vld [vmem:[#allocation5 + $0x8] sm:$0xff]   ;;  %v945_v11 = vld [vmem:[#allocation5] sm:$0xff]  }
  0x35   :  { %849 = vmatprep.subr.bf16.mxu1 %v954_v7  ;;  %v956_v10 = vld [vmem:[#allocation7 + $0x28] sm:$0xff]   ;;  %v957_v12 = vld [vmem:[#allocation7 + $0x20] sm:$0xff]   ;;  %v958_v13 = vld [vmem:[#allocation7 + $0x18] sm:$0xff]  }
  0x36   :  { %850 = vmatpush3.bf16.msra.mxu1 %v954_v7  ;;  %v947_v14 = vld [vmem:[#allocation2 + $0x8] sm:$0xff]   ;;  %v948_v15 = vld [vmem:[#allocation2 + $0x10] sm:$0xff]   ;;  %v949_v16 = vld [vmem:[#allocation2 + $0x18] sm:$0xff]  }
  0x37   :  { %820 = vmatpush3.bf16.msra.mxu0 %v939_v1  ;;  %851 = vmatprep.subr.bf16.mxu1 %v955_v8  ;;  %v950_v17 = vld [vmem:[#allocation2 + $0x20] sm:$0xff]   ;;  %v951_v18 = vld [vmem:[#allocation2 + $0x28] sm:$0xff]   ;;  %v952_v19 = vld [vmem:[#allocation2 + $0x30] sm:$0xff]  }
  0x38   :  { %821 = vmatprep.subr.bf16.mxu0 %v940_v2  ;;  %v953_v20 = vld [vmem:[#allocation2 + $0x38] sm:$0xff]   ;;  %v959_v21 = vld [vmem:[#allocation7 + $0x10] sm:$0xff]   ;;  %v960_v22 = vld [vmem:[#allocation7 + $0x8] sm:$0xff]  }
  0x39   :  { %v961_v23 = vld [vmem:[#allocation7] sm:$0xff]   ;;  %v962_v24 = vld [vmem:[#allocation8 + $0x38] sm:$0xff]   ;;  %v963_v25 = vld [vmem:[#allocation8 + $0x30] sm:$0xff]  }
  0x3a   :  { %852 = vmatpush3.bf16.msra.mxu1 %v955_v8  ;;  %v964_v26 = vld [vmem:[#allocation8 + $0x28] sm:$0xff]   ;;  %v965_v27 = vld [vmem:[#allocation8 + $0x20] sm:$0xff]   ;;  %v1151_v28 = vld [vmem:[#allocation8 + $0x18] sm:$0xff]  }
  0x3b   :  { %822 = vmatpush3.bf16.msra.mxu0 %v940_v2  ;;  %853 = vmatprep.subr.bf16.mxu1 %v956_v10  ;;  %v734_v31 = vld [vmem:[%s1171_s2] ss:$0 sm:$0xff] }
  0x3c   :  { %823 = vmatprep.subr.bf16.mxu0 %v941_v3 }
  0x3e   :  { %854 = vmatpush3.bf16.msra.mxu1 %v956_v10 }
  0x3f   :  { %824 = vmatpush3.bf16.msra.mxu0 %v941_v3  ;;  %855 = vmatprep.subr.bf16.mxu1 %v957_v12 }
  0x40   :  { %825 = vmatprep.subr.bf16.mxu0 %v942_v5 }
  0x42   :  { %856 = vmatpush3.bf16.msra.mxu1 %v957_v12 }
  0x43   :  { %826 = vmatpush3.bf16.msra.mxu0 %v942_v5  ;;  %857 = vmatprep.subr.bf16.mxu1 %v958_v13 }
  0x44   :  { %827 = vmatprep.subr.bf16.mxu0 %v943_v6 }
  0x46   :  { %858 = vmatpush3.bf16.msra.mxu1 %v958_v13 }
  0x47   :  { %828 = vmatpush3.bf16.msra.mxu0 %v943_v6  ;;  %859 = vmatprep.subr.bf16.mxu1 %v959_v21 }
  0x48   :  { %829 = vmatprep.subr.bf16.mxu0 %v944_v9 }
  0x4a   :  { %860 = vmatpush3.bf16.msra.mxu1 %v959_v21 }
  0x4b   :  { %830 = vmatpush3.bf16.msra.mxu0 %v944_v9  ;;  %861 = vmatprep.subr.bf16.mxu1 %v960_v22 }
  0x4c   :  { %831 = vmatprep.subr.bf16.mxu0 %v945_v11 }
  0x4e   :  { %862 = vmatpush3.bf16.msra.mxu1 %v960_v22  ;;  %v967_v22 = vld [vmem:[#allocation8 + $0x10] sm:$0xff]  }
  0x4f   :  { %832 = vmatpush3.bf16.msra.mxu0 %v945_v11  ;;  %863 = vmatprep.subr.bf16.mxu1 %v961_v23 }
  0x50   :  { %881 = vmatprep.subr.bf16.mxu0 %v962_v24 }
  0x52   :  { %834 = vmatmul.mubr.bf16.vlgmr.msra.gmra.mxu0 %v947_v14  ;;  %864 = vmatpush3.bf16.msra.mxu1 %v961_v23  ;;  %v968_v23 = vld [vmem:[#allocation8 + $0x8] sm:$0xff]  }
  0x53   :  { %837 = vmatprep.mubr.bf16.mxu0 %v948_v15  ;;  %913 = vmatprep.subr.bf16.mxu1 %v962_v24 }
  0x54   :  { %882 = vmatpush3.bf16.msra.mxu0 %v962_v24 }
  0x55   :  { %883 = vmatprep.subr.bf16.mxu0 %v963_v25 }
  0x58   :  { %884 = vmatpush3.bf16.msra.mxu0 %v963_v25 }
  0x59   :  { %885 = vmatprep.subr.bf16.mxu0 %v964_v26 }
  0x5a   :  { %838 = vmatmul.mubr.bf16.gmra.mxu0 %v949_v16 }
  0x5b   :  { %841 = vmatprep.mubr.bf16.mxu0 %v950_v17 }
  0x5c   :  { %886 = vmatpush3.bf16.msra.mxu0 %v964_v26 }
  0x5d   :  { %887 = vmatprep.subr.bf16.mxu0 %v965_v27 }
  0x60   :  { %888 = vmatpush3.bf16.msra.mxu0 %v965_v27 }
  0x61   :  { %889 = vmatprep.subr.bf16.mxu0 %v1151_v28 }
  0x62   :  { %842 = vmatmul.mubr.bf16.gmra.mxu0 %v951_v18 }
  0x63   :  { %845 = vmatprep.mubr.bf16.mxu0 %v952_v19 }
  0x64   :  { %890 = vmatpush3.bf16.msra.mxu0 %v1151_v28 }
  0x65   :  { %891 = vmatprep.subr.bf16.mxu0 %v967_v22 }
  0x68   :  { %892 = vmatpush3.bf16.msra.mxu0 %v967_v22 }
  0x69   :  { %893 = vmatprep.subr.bf16.mxu0 %v968_v23 }
  0x6a   :  { %846 = vmatmul.mubr.bf16.gmra.mxu0 %v953_v20 }
  0x6c   :  { %894 = vmatpush3.bf16.msra.mxu0 %v968_v23 }
 0x112   :  { %v835_v29 = vpop.f32.mrf.mxu0 }
 0x113   :  { %v261_v35 = vadd.f32 %v835_v29, %v734_v31 }
 0x114   :  { %v252_v30 = vpop.f32.mrf.mxu0 }
 0x115   :  { %v253_v33 = vadd.f32 %v734_v31, %v252_v30  ;;  %v317_v42 = vmax.f32 %v261_v35, 0.0 }
 0x116   :  { %v836_v32 = vpop.f32.mrf.mxu0 }
 0x117   :  { %v264_v34 = vadd.f32 %v836_v32, %v734_v31  ;;  %v315_v40 = vmax.f32 %v253_v33, 0.0 }
 0x118   :  { %v255_v36 = vpop.f32.mrf.mxu0 }
 0x119   :  { %v256_v37 = vadd.f32 %v734_v31, %v255_v36  ;;  %v318_v38 = vmax.f32 %v264_v34, 0.0 }
 0x11a   :  { %v839_v39 = vpop.f32.mrf.mxu0 }
 0x11b   :  { %v316_v41 = vmax.f32 %v256_v37, 0.0  ;;  %v332_v45 = vpack.c.bf16 %v318_v38, %v317_v42  ;;  %v277_v49 = vadd.f32 %v839_v39, %v734_v31 }
 0x11c   :  { %v268_v43 = vpop.f32.mrf.mxu0 }
 0x11d   :  { %v331_v44 = vpack.c.bf16 %v316_v41, %v315_v40  ;;  %v269_v47 = vadd.f32 %v734_v31, %v268_v43  ;;  %v321_v56 = vmax.f32 %v277_v49, 0.0 }
 0x11e   :  { %v840_v46 = vpop.f32.mrf.mxu0 }
 0x11f   :  { %v280_v48 = vadd.f32 %v840_v46, %v734_v31  ;;  %865 = vmatprep.mubr.bf16.mxu1 %v331_v44  ;;  %v319_v54 = vmax.f32 %v269_v47, 0.0 }
 0x120   :  { %v271_v50 = vpop.f32.mrf.mxu0  ;;  %866 = vmatmul.mubr.bf16.vlgmr.msra.gmra.mxu1 %v332_v45 }
 0x121   :  { %v272_v51 = vadd.f32 %v734_v31, %v271_v50  ;;  %921 = vmatpush3.bf16.msra.mxu1 %v962_v24  ;;  %v322_v52 = vmax.f32 %v280_v48, 0.0  ;;  %v969_v24 = vld [vmem:[#allocation8] sm:$0xff]  }
 0x122   :  { %v843_v53 = vpop.f32.mrf.mxu0  ;;  %914 = vmatprep.subr.bf16.mxu1 %v963_v25  ;;  %895 = vmatprep.subr.bf16.mxu0 %v969_v24 }
 0x123   :  { %v320_v55 = vmax.f32 %v272_v51, 0.0  ;;  %v334_v59 = vpack.c.bf16 %v322_v52, %v321_v56  ;;  %v293_v63 = vadd.f32 %v843_v53, %v734_v31  ;;  %896 = vmatpush3.bf16.msra.mxu0 %v969_v24 }
 0x124   :  { %v284_v57 = vpop.f32.mrf.mxu0 }
 0x125   :  { %v333_v58 = vpack.c.bf16 %v320_v55, %v319_v54  ;;  %922 = vmatpush3.bf16.msra.mxu1 %v963_v25  ;;  %v285_v61 = vadd.f32 %v734_v31, %v284_v57  ;;  %v325_v6 = vmax.f32 %v293_v63, 0.0 }
 0x126   :  { %v844_v60 = vpop.f32.mrf.mxu0  ;;  %915 = vmatprep.subr.bf16.mxu1 %v964_v26 }
 0x127   :  { %v296_v62 = vadd.f32 %v844_v60, %v734_v31  ;;  %869 = vmatprep.mubr.bf16.mxu1 %v333_v58  ;;  %v323_v4 = vmax.f32 %v285_v61, 0.0 }
 0x128   :  { %v287_v0 = vpop.f32.mrf.mxu0  ;;  %870 = vmatmul.mubr.bf16.gmra.mxu1 %v334_v59 }
 0x129   :  { %v288_v1 = vadd.f32 %v734_v31, %v287_v0  ;;  %923 = vmatpush3.bf16.msra.mxu1 %v964_v26  ;;  %v326_v2 = vmax.f32 %v296_v62, 0.0 }
 0x12a   :  { %v847_v3 = vpop.f32.mrf.mxu0  ;;  %916 = vmatprep.subr.bf16.mxu1 %v965_v27 }
 0x12b   :  { %v324_v5 = vmax.f32 %v288_v1, 0.0  ;;  %v336_v9 = vpack.c.bf16 %v326_v2, %v325_v6  ;;  %v309_v13 = vadd.f32 %v847_v3, %v734_v31 }
 0x12c   :  { %v300_v7 = vpop.f32.mrf.mxu0 }
 0x12d   :  { %v335_v8 = vpack.c.bf16 %v324_v5, %v323_v4  ;;  %924 = vmatpush3.bf16.msra.mxu1 %v965_v27  ;;  %v301_v11 = vadd.f32 %v734_v31, %v300_v7  ;;  %v329_v19 = vmax.f32 %v309_v13, 0.0  ;;  %v751_v27 = vld [vmem:[%s1173_s4] ss:$0 sm:$0xff] }
 0x12e   :  { %v848_v10 = vpop.f32.mrf.mxu0  ;;  %917 = vmatprep.subr.bf16.mxu1 %v1151_v28 }
 0x12f   :  { %v312_v12 = vadd.f32 %v848_v10, %v734_v31  ;;  %873 = vmatprep.mubr.bf16.mxu1 %v335_v8  ;;  %v327_v17 = vmax.f32 %v301_v11, 0.0 }
 0x130   :  { %v303_v14 = vpop.f32.mrf.mxu0  ;;  %874 = vmatmul.mubr.bf16.gmra.mxu1 %v336_v9 }
 0x131   :  { %v304_v15 = vadd.f32 %v734_v31, %v303_v14  ;;  %925 = vmatpush3.bf16.msra.mxu1 %v1151_v28  ;;  %v330_v16 = vmax.f32 %v312_v12, 0.0 }
 0x132   :  { %918 = vmatprep.subr.bf16.mxu1 %v967_v22 }
 0x133   :  { %v328_v18 = vmax.f32 %v304_v15, 0.0  ;;  %v338_v21 = vpack.c.bf16 %v330_v16, %v329_v19 }
 0x135   :  { %v337_v20 = vpack.c.bf16 %v328_v18, %v327_v17  ;;  %926 = vmatpush3.bf16.msra.mxu1 %v967_v22  ;;  %v760_v18 = vld [vmem:[%s1175_s6] ss:$0 sm:$0xff]  ;;  %s1084_s6 = smov [#allocation10]  }
 0x136   :  { %919 = vmatprep.subr.bf16.mxu1 %v968_v23  ;;  %s720_s23 = sshll.u32 %s1084_s6, 4  ;;  %s721_s23 = int_to_ptr.vmem [resolvable:$true] %s720_s23 }
 0x137   :  { %877 = vmatprep.mubr.bf16.mxu1 %v337_v20  ;;  %s1050_s24 = scalar_lea.vmem %s721_s23, 2048  ;;  %p1055_p7 = scmp.lt.s32.totalorder %s721_s23, %s721_s23 }
 0x138   :  { %878 = vmatmul.mubr.bf16.gmra.mxu1 %v338_v21  ;;  %p1051_p6 = scmp.ne.s32.totalorder %s721_s23, %s1050_s24  ;;  %p1056_p8 = scmp.lt.s32.totalorder %s1050_s24, %s1050_s24 }
 0x139   :  { %927 = vmatpush3.bf16.msra.mxu1 %v968_v23 }
 0x13a   :  { %920 = vmatprep.subr.bf16.mxu1 %v969_v24  ;;  %p1057_p9 = por %p1056_p8, %p1055_p7 }
 0x13c   :  { %p1058_p10 = pnand %p1057_p9, %p1051_p6 }
 0x13d   :  { %928 = vmatpush3.bf16.msra.mxu1 %v969_v24 }
 0x1e0   :  { %v867_v25 = vpop.f32.mrf.mxu1 }
 0x1e1   :  { %v453_v31 = vadd.f32 %v867_v25, %v751_v27 }
 0x1e2   :  { %v444_v26 = vpop.f32.mrf.mxu1 }
 0x1e3   :  { %v445_v29 = vadd.f32 %v751_v27, %v444_v26  ;;  %v509_v38 = vmax.f32 %v453_v31, 0.0 }
 0x1e4   :  { %v868_v28 = vpop.f32.mrf.mxu1 }
 0x1e5   :  { %v456_v30 = vadd.f32 %v868_v28, %v751_v27  ;;  %v507_v36 = vmax.f32 %v445_v29, 0.0 }
 0x1e6   :  { %v447_v32 = vpop.f32.mrf.mxu1 }
 0x1e7   :  { %v448_v33 = vadd.f32 %v751_v27, %v447_v32  ;;  %v510_v34 = vmax.f32 %v456_v30, 0.0 }
 0x1e8   :  { %v871_v35 = vpop.f32.mrf.mxu1 }
 0x1e9   :  { %v508_v37 = vmax.f32 %v448_v33, 0.0  ;;  %v524_v41 = vpack.c.bf16 %v510_v34, %v509_v38  ;;  %v469_v45 = vadd.f32 %v871_v35, %v751_v27 }
 0x1ea   :  { %v460_v39 = vpop.f32.mrf.mxu1 }
 0x1eb   :  { %v523_v40 = vpack.c.bf16 %v508_v37, %v507_v36  ;;  %v461_v43 = vadd.f32 %v751_v27, %v460_v39  ;;  %v513_v52 = vmax.f32 %v469_v45, 0.0 }
 0x1ec   :  { %v872_v42 = vpop.f32.mrf.mxu1 }
 0x1ed   :  { %v472_v44 = vadd.f32 %v872_v42, %v751_v27  ;;  %897 = vmatprep.mubr.bf16.mxu0 %v523_v40  ;;  %v511_v50 = vmax.f32 %v461_v43, 0.0 }
 0x1ee   :  { %v463_v46 = vpop.f32.mrf.mxu1  ;;  %898 = vmatmul.mubr.bf16.vlgmr.msra.gmra.mxu0 %v524_v41 }
 0x1ef   :  { %v464_v47 = vadd.f32 %v751_v27, %v463_v46  ;;  %v514_v48 = vmax.f32 %v472_v44, 0.0 }
 0x1f0   :  { %v875_v49 = vpop.f32.mrf.mxu1 }
 0x1f1   :  { %v512_v51 = vmax.f32 %v464_v47, 0.0  ;;  %v526_v55 = vpack.c.bf16 %v514_v48, %v513_v52  ;;  %v485_v59 = vadd.f32 %v875_v49, %v751_v27 }
 0x1f2   :  { %v476_v53 = vpop.f32.mrf.mxu1 }
 0x1f3   :  { %v525_v54 = vpack.c.bf16 %v512_v51, %v511_v50  ;;  %v477_v57 = vadd.f32 %v751_v27, %v476_v53  ;;  %v517_v2 = vmax.f32 %v485_v59, 0.0 }
 0x1f4   :  { %v876_v56 = vpop.f32.mrf.mxu1 }
 0x1f5   :  { %v488_v58 = vadd.f32 %v876_v56, %v751_v27  ;;  %901 = vmatprep.mubr.bf16.mxu0 %v525_v54  ;;  %v515_v0 = vmax.f32 %v477_v57, 0.0 }
 0x1f6   :  { %v479_v60 = vpop.f32.mrf.mxu1  ;;  %902 = vmatmul.mubr.bf16.gmra.mxu0 %v526_v55 }
 0x1f7   :  { %v480_v61 = vadd.f32 %v751_v27, %v479_v60  ;;  %v518_v62 = vmax.f32 %v488_v58, 0.0 }
 0x1f8   :  { %v879_v63 = vpop.f32.mrf.mxu1 }
 0x1f9   :  { %v516_v1 = vmax.f32 %v480_v61, 0.0  ;;  %v528_v5 = vpack.c.bf16 %v518_v62, %v517_v2  ;;  %v501_v9 = vadd.f32 %v879_v63, %v751_v27 }
 0x1fa   :  { %v492_v3 = vpop.f32.mrf.mxu1 }
 0x1fb   :  { %v527_v4 = vpack.c.bf16 %v516_v1, %v515_v0  ;;  %v493_v7 = vadd.f32 %v751_v27, %v492_v3  ;;  %v521_v15 = vmax.f32 %v501_v9, 0.0 }
 0x1fc   :  { %v880_v6 = vpop.f32.mrf.mxu1 }
 0x1fd   :  { %v504_v8 = vadd.f32 %v880_v6, %v751_v27  ;;  %905 = vmatprep.mubr.bf16.mxu1 %v527_v4  ;;  %v519_v13 = vmax.f32 %v493_v7, 0.0 }
 0x1fe   :  { %v495_v10 = vpop.f32.mrf.mxu1  ;;  %906 = vmatmul.mubr.bf16.vlgmr.msra.gmra.mxu1 %v528_v5 }
 0x1ff   :  { %v496_v11 = vadd.f32 %v751_v27, %v495_v10  ;;  %v522_v12 = vmax.f32 %v504_v8, 0.0 }
 0x201   :  { %v520_v14 = vmax.f32 %v496_v11, 0.0  ;;  %v530_v17 = vpack.c.bf16 %v522_v12, %v521_v15 }
 0x203   :  { %v529_v16 = vpack.c.bf16 %v520_v14, %v519_v13 }
 0x205   :  { %909 = vmatprep.mubr.bf16.mxu1 %v529_v16 }
 0x206   :  { %910 = vmatmul.mubr.bf16.gmra.mxu1 %v530_v17 }
 0x2ae   :  { %v899_v19 = vpop.f32.mrf.mxu0 }
 0x2af   :  { %v645_v20 = vadd.f32 %v899_v19, %v760_v18 }
 0x2b0   :  { %v636_v21 = vpop.f32.mrf.mxu0 }
 0x2b1   :  { %701 = vst [vmem:[#allocation10 + $0x10] sm:$0xff] %v645_v20  ;;  %v637_v22 = vadd.f32 %v760_v18, %v636_v21 }
 0x2b2   :  { %v900_v23 = vpop.f32.mrf.mxu0 }
 0x2b3   :  { %699 = vst [vmem:[#allocation10] sm:$0xff] %v637_v22  ;;  %v648_v24 = vadd.f32 %v900_v23, %v760_v18 }
 0x2b4   :  { %v639_v25 = vpop.f32.mrf.mxu0 }
 0x2b5   :  { %702 = vst [vmem:[#allocation10 + $0x18] sm:$0xff] %v648_v24  ;;  %v640_v26 = vadd.f32 %v760_v18, %v639_v25 }
 0x2b6   :  { %v903_v27 = vpop.f32.mrf.mxu0 }
 0x2b7   :  { %700 = vst [vmem:[#allocation10 + $0x8] sm:$0xff] %v640_v26  ;;  %v661_v28 = vadd.f32 %v903_v27, %v760_v18 }
 0x2b8   :  { %v652_v29 = vpop.f32.mrf.mxu0 }
 0x2b9   :  { %705 = vst [vmem:[#allocation10 + $0x30] sm:$0xff] %v661_v28  ;;  %v653_v30 = vadd.f32 %v760_v18, %v652_v29 }
 0x2ba   :  { %v904_v31 = vpop.f32.mrf.mxu0 }
 0x2bb   :  { %703 = vst [vmem:[#allocation10 + $0x20] sm:$0xff] %v653_v30  ;;  %v664_v32 = vadd.f32 %v904_v31, %v760_v18 }
 0x2bc   :  { %v655_v33 = vpop.f32.mrf.mxu0 }
 0x2bd   :  { %706 = vst [vmem:[#allocation10 + $0x38] sm:$0xff] %v664_v32  ;;  %v656_v34 = vadd.f32 %v760_v18, %v655_v33 }
 0x2be   :  { %v907_v35 = vpop.f32.mrf.mxu1 }
 0x2bf   :  { %704 = vst [vmem:[#allocation10 + $0x28] sm:$0xff] %v656_v34  ;;  %v677_v36 = vadd.f32 %v907_v35, %v760_v18 }
 0x2c0   :  { %v668_v37 = vpop.f32.mrf.mxu1 }
 0x2c1   :  { %709 = vst [vmem:[#allocation10 + $0x50] sm:$0xff] %v677_v36  ;;  %v669_v38 = vadd.f32 %v760_v18, %v668_v37 }
 0x2c2   :  { %v908_v39 = vpop.f32.mrf.mxu1 }
 0x2c3   :  { %707 = vst [vmem:[#allocation10 + $0x40] sm:$0xff] %v669_v38  ;;  %v680_v40 = vadd.f32 %v908_v39, %v760_v18 }
 0x2c4   :  { %v671_v41 = vpop.f32.mrf.mxu1 }
 0x2c5   :  { %710 = vst [vmem:[#allocation10 + $0x58] sm:$0xff] %v680_v40  ;;  %v672_v42 = vadd.f32 %v760_v18, %v671_v41 }
 0x2c6   :  { %v911_v43 = vpop.f32.mrf.mxu1 }
 0x2c7   :  { %708 = vst [vmem:[#allocation10 + $0x48] sm:$0xff] %v672_v42  ;;  %v693_v44 = vadd.f32 %v911_v43, %v760_v18 }
 0x2c8   :  { %v684_v45 = vpop.f32.mrf.mxu1 }
 0x2c9   :  { %713 = vst [vmem:[#allocation10 + $0x70] sm:$0xff] %v693_v44  ;;  %v685_v46 = vadd.f32 %v760_v18, %v684_v45 }
 0x2ca   :  { %v912_v47 = vpop.f32.mrf.mxu1 }
 0x2cb   :  { %711 = vst [vmem:[#allocation10 + $0x60] sm:$0xff] %v685_v46  ;;  %v696_v48 = vadd.f32 %v912_v47, %v760_v18 }
 0x2cc   :  { %v687_v49 = vpop.f32.mrf.mxu1 }
 0x2cd   :  { %714 = vst [vmem:[#allocation10 + $0x78] sm:$0xff] %v696_v48  ;;  %v688_v50 = vadd.f32 %v760_v18, %v687_v49 }
 0x2cf   :  { %712 = vst [vmem:[#allocation10 + $0x68] sm:$0xff] %v688_v50 }
 0x2d0   :  { %1061 = shalt.err (!%p1058_p10)
}
 0x2d1   :  { %s1085_s25 = smov 128   ;;  %s1086_s26 = smov 8  }
 0x2d2   :  { %726 = dma.vmem_to_hbm [thread:$0]  %s721_s23, 2048, %s1176_s7, [#allocation4], %s1085_s25, %s1085_s25, %s1086_s26  }
 0x2d3   :  { %1076 = dma.done.wait [#allocation4], 2048  }
 0x2d4   :  { %1077 = vsyncadd [#allocation4], 4294965248 }
 0x2d5   :  { %730 = vsyncpa [#allocation3], 1 }
 0x2d6   :  { %731 = vsyncpa [#allocation6], 1 }
 0x2d7   :  { %732 = vsyncpa [#allocation9], 1 }
 0x2d8   :  { %733 = vsyncpa [#allocation4], 1 }

</bundles_post_ra>
